<compile_context>
chip_gen: v5e
topology: v5e:2x2
jax: 0.10.0
libtpu: 0.0.40
codegen_flags: <defaults>
</compile_context>

<pallas_src>
import math
import jax
import jax.numpy as jnp
from jax import lax
from jax.experimental import pallas as pl
from jax.experimental.pallas import tpu as pltpu

NEG_INF = -1e9                     # additive mask value (avoids inf-inf NaN)
VMEM_LIMIT = 32 * 1024 * 1024      # safe scoped-VMEM budget on v5e/v6e/v7x


# --------------------------------------------------------------------------
# In-kernel helpers
# --------------------------------------------------------------------------

def _ln(x, g, b, eps):
    mu = jnp.mean(x, axis=-1, keepdims=True)
    var = jnp.mean(jnp.square(x - mu), axis=-1, keepdims=True)
    return (x - mu) * lax.rsqrt(var + eps) * g + b


def _bf16(x):
    return x.astype(jnp.bfloat16)


def _row_tile(m, pref=512):
    if m <= pref:
        return m
    for t in (512, 256, 128, 64, 32, 16, 8):
        if m % t == 0:
            return t
    return m


def _col_tile(n, pref=512):
    if n % 128 != 0 or n <= pref:
        return n
    for t in (pref, 256, 128):
        if n % t == 0:
            return t
    return n


# --------------------------------------------------------------------------
# Fused attention sublayer kernel
#   [pre-LN] -> Q proj + fused KV proj -> multi-head SDPA (mask built in-kernel)
#   -> out proj -> residual -> [post-LN]
# --------------------------------------------------------------------------

def _attn_block_kernel(*, nhead, d_model, sq, sk, scale, causal, is_self,
                       norm_first, eps):
    hd = d_model // nhead

    def kernel(q_ref, kv_ref, pad_ref, wq_ref, bq_ref, wkv_ref, bkv_ref,
               wo_ref, bo_ref, g_ref, be_ref, o_ref):
        x = q_ref[0]                       # (Sq, D) f32
        kv_in = kv_ref[0]                  # (Sk, D) f32
        g = g_ref[...]
        be = be_ref[...]

        if norm_first:
            xq = _ln(x, g, be, eps)
            kv_src = xq if is_self else kv_in
        else:
            xq = x
            kv_src = kv_in

        # Projections: bf16 weights on the MXU, f32 accumulation.
        q = jnp.dot(_bf16(xq), wq_ref[...],
                    preferred_element_type=jnp.float32) + bq_ref[...]
        kv = jnp.dot(_bf16(kv_src), wkv_ref[...],
                     preferred_element_type=jnp.float32) + bkv_ref[...]
        k = kv[:, :d_model]
        v = kv[:, d_model:]

        # Additive mask: key-padding bias (shared across heads/queries) plus a
        # causal term built in-kernel with iota (nothing materialized in HBM).
        bias = pad_ref[0]                  # (1, Sk)
        if causal:
            row = lax.broadcasted_iota(jnp.int32, (sq, sk), 0)
            col = lax.broadcasted_iota(jnp.int32, (sq, sk), 1)
            bias = bias + jnp.where(col > row, NEG_INF, 0.0).astype(jnp.float32)

        # All heads inside one kernel (static unroll; attention math kept f32).
        head_outs = []
        for h in range(nhead):
            sl = slice(h * hd, (h + 1) * hd)
            qh = q[:, sl]
            kh = k[:, sl]
            vh = v[:, sl]
            s = jnp.dot(qh, kh.T, preferred_element_type=jnp.float32) * scale
            s = s + bias
            m = jnp.max(s, axis=-1, keepdims=True)
            p = jnp.exp(s - m)
            denom = jnp.sum(p, axis=-1, keepdims=True)
            p = p * pl.reciprocal(denom, approx=True)       # EUP, frees VPU
            head_outs.append(jnp.dot(p, vh, preferred_element_type=jnp.float32))
        o = jnp.concatenate(head_outs, axis=-1)             # (Sq, D)

        proj = jnp.dot(_bf16(o), wo_ref[...],
                       preferred_element_type=jnp.float32) + bo_ref[...]
        y = x + proj                                         # residual (fused)
        if not norm_first:
            y = _ln(y, g, be, eps)                           # post-LN (fused)
        o_ref[0] = y

    return kernel


def attn_block_pallas(q_in, kv_in, pad_bias, p, norm, *, nhead, causal, is_self,
                      norm_first, eps=1e-5):
    """q_in: (B,Sq,D), kv_in: (B,Sk,D), pad_bias: (B,1,Sk) additive f32."""
    B, Sq, D = q_in.shape
    Sk = kv_in.shape[1]
    scale = 1.0 / math.sqrt(D // nhead)
    kernel = _attn_block_kernel(nhead=nhead, d_model=D, sq=Sq, sk=Sk,
                                scale=scale, causal=causal, is_self=is_self,
                                norm_first=norm_first, eps=eps)
    full2d = lambda b: (0, 0)
    return pl.pallas_call(
        kernel,
        out_shape=jax.ShapeDtypeStruct((B, Sq, D), jnp.float32),
        grid=(B,),
        in_specs=[
            pl.BlockSpec((1, Sq, D), lambda b: (b, 0, 0)),
            pl.BlockSpec((1, Sk, D), lambda b: (b, 0, 0)),
            pl.BlockSpec((1, 1, Sk), lambda b: (b, 0, 0)),
            pl.BlockSpec((D, D), full2d),          # w_q (bf16)
            pl.BlockSpec((1, D), full2d),          # b_q
            pl.BlockSpec((D, 2 * D), full2d),      # w_kv (bf16, fused K|V)
            pl.BlockSpec((1, 2 * D), full2d),      # b_kv
            pl.BlockSpec((D, D), full2d),          # w_o (bf16)
            pl.BlockSpec((1, D), full2d),          # b_o
            pl.BlockSpec((1, D), full2d),          # gamma
            pl.BlockSpec((1, D), full2d),          # beta
        ],
        out_specs=pl.BlockSpec((1, Sq, D), lambda b: (b, 0, 0)),
        compiler_params=pltpu.CompilerParams(
            dimension_semantics=("parallel",),
            vmem_limit_bytes=VMEM_LIMIT),
    )(q_in, kv_in, pad_bias,
      p["w_q"], p["b_q"].reshape(1, D),
      p["w_kv"], p["b_kv"].reshape(1, 2 * D),
      p["w_o"], p["b_o"].reshape(1, D),
      norm["gamma"].reshape(1, D), norm["beta"].reshape(1, D))


# --------------------------------------------------------------------------
# Fused FFN sublayer kernel: [pre-LN] -> lin1 -> ReLU -> lin2 -> residual -> [post-LN]
# --------------------------------------------------------------------------

def _ffn_block_kernel(*, norm_first, eps):
    def kernel(x_ref, w1_ref, b1_ref, w2_ref, b2_ref, g_ref, be_ref, o_ref):
        x = x_ref[...]
        g = g_ref[...]
        be = be_ref[...]
        h_in = _ln(x, g, be, eps) if norm_first else x
        h = jnp.dot(_bf16(h_in), w1_ref[...],
                    preferred_element_type=jnp.float32) + b1_ref[...]
        h = jnp.maximum(h, 0.0)
        y = jnp.dot(_bf16(h), w2_ref[...],
                    preferred_element_type=jnp.float32) + b2_ref[...]
        y = x + y
        if not norm_first:
            y = _ln(y, g, be, eps)
        o_ref[...] = y
    return kernel


def ffn_block_pallas(x, lin1, lin2, norm, *, norm_first, eps=1e-5):
    B, S, D = x.shape
    M = B * S
    dff = lin1["w"].shape[1]
    tm = _row_tile(M)
    full2d = lambda i: (0, 0)
    y = pl.pallas_call(
        _ffn_block_kernel(norm_first=norm_first, eps=eps),
        out_shape=jax.ShapeDtypeStruct((M, D), jnp.float32),
        grid=(M // tm,),
        in_specs=[
            pl.BlockSpec((tm, D), lambda i: (i, 0)),
            pl.BlockSpec((D, dff), full2d),        # w1 (bf16)
            pl.BlockSpec((1, dff), full2d),
            pl.BlockSpec((dff, D), full2d),        # w2 (bf16)
            pl.BlockSpec((1, D), full2d),
            pl.BlockSpec((1, D), full2d),          # gamma
            pl.BlockSpec((1, D), full2d),          # beta
        ],
        out_specs=pl.BlockSpec((tm, D), lambda i: (i, 0)),
        compiler_params=pltpu.CompilerParams(
            dimension_semantics=("parallel",),
            vmem_limit_bytes=VMEM_LIMIT),
    )(x.reshape(M, D),
      lin1["w"], lin1["b"].reshape(1, dff),
      lin2["w"], lin2["b"].reshape(1, D),
      norm["gamma"].reshape(1, D), norm["beta"].reshape(1, D))
    return y.reshape(B, S, D)


# --------------------------------------------------------------------------
# Standalone LayerNorm (encoder final norm only)
# --------------------------------------------------------------------------

def _layernorm_kernel(eps):
    def kernel(x_ref, g_ref, b_ref, o_ref):
        o_ref[...] = _ln(x_ref[...], g_ref[...], b_ref[...], eps)
    return kernel


def layernorm_pallas(x, norm, eps=1e-5):
    B, S, D = x.shape
    M = B * S
    tm = _row_tile(M)
    y = pl.pallas_call(
        _layernorm_kernel(eps),
        out_shape=jax.ShapeDtypeStruct((M, D), jnp.float32),
        grid=(M // tm,),
        in_specs=[pl.BlockSpec((tm, D), lambda i: (i, 0)),
                  pl.BlockSpec((1, D), lambda i: (0, 0)),
                  pl.BlockSpec((1, D), lambda i: (0, 0))],
        out_specs=pl.BlockSpec((tm, D), lambda i: (i, 0)),
        compiler_params=pltpu.CompilerParams(
            dimension_semantics=("parallel",),
            vmem_limit_bytes=VMEM_LIMIT),
    )(x.reshape(M, D), norm["gamma"].reshape(1, D), norm["beta"].reshape(1, D))
    return y.reshape(B, S, D)


# --------------------------------------------------------------------------
# Fused head: decoder final LN -> lin1 -> GELU(erf) -> vocab projection
# Grid over row tiles and (when V is a multiple of 128) vocab column tiles.
# --------------------------------------------------------------------------

def _head_kernel(*, eps):
    def kernel(x_ref, g_ref, be_ref, w1_ref, b1_ref, w2_ref, b2_ref, o_ref):
        x = _ln(x_ref[...], g_ref[...], be_ref[...], eps)     # decoder final LN
        h = jnp.dot(_bf16(x), w1_ref[...],
                    preferred_element_type=jnp.float32) + b1_ref[...]
        h = jax.nn.gelu(h, approximate=False)                 # matches nn.GELU()
        o_ref[...] = jnp.dot(_bf16(h), w2_ref[...],
                             preferred_element_type=jnp.float32) + b2_ref[...]
    return kernel


def final_head_pallas(y, norm, lin1, lin2, eps=1e-5):
    B, S, D = y.shape
    M = B * S
    dff = lin1["w"].shape[1]
    V = lin2["w"].shape[1]
    tm = _row_tile(M)
    tn = _col_tile(V)       # NOTE: LN+lin1 recomputed per vocab tile (cheap vs DMA)
    out = pl.pallas_call(
        _head_kernel(eps=eps),
        out_shape=jax.ShapeDtypeStruct((M, V), jnp.float32),
        grid=(M // tm, V // tn),
        in_specs=[
            pl.BlockSpec((tm, D), lambda i, j: (i, 0)),
            pl.BlockSpec((1, D), lambda i, j: (0, 0)),
            pl.BlockSpec((1, D), lambda i, j: (0, 0)),
            pl.BlockSpec((D, dff), lambda i, j: (0, 0)),   # lin1 w (bf16)
            pl.BlockSpec((1, dff), lambda i, j: (0, 0)),
            pl.BlockSpec((dff, tn), lambda i, j: (0, j)),  # lin2 w (bf16), vocab tiled
            pl.BlockSpec((1, tn), lambda i, j: (0, j)),
        ],
        out_specs=pl.BlockSpec((tm, tn), lambda i, j: (i, j)),
        compiler_params=pltpu.CompilerParams(
            dimension_semantics=("parallel", "parallel"),
            vmem_limit_bytes=VMEM_LIMIT),
    )(y.reshape(M, D),
      norm["gamma"].reshape(1, D), norm["beta"].reshape(1, D),
      lin1["w"], lin1["b"].reshape(1, dff),
      lin2["w"], lin2["b"].reshape(1, V))
    return out.reshape(B, S, V)


# --------------------------------------------------------------------------
# Model glue
# --------------------------------------------------------------------------

def pad_bias_from_ids(ids):
    # get_key_padding_mask assumed: pad token id 0, True = ignored key position.
    # Stored as a tiny (B, 1, Sk) additive bias shared across heads and queries.
    return jnp.where(ids == 0, NEG_INF, 0.0).astype(jnp.float32)[:, None, :]


def positional_embedding(maxlen, d_model, n=10000.0):
    assert maxlen % 2 == 0
    pos = jnp.arange(maxlen, dtype=jnp.float32)[:, None]
    denom = n ** (jnp.arange(0, d_model, 2, dtype=jnp.float32) / d_model)
    ang = pos / denom
    pe = jnp.zeros((maxlen, d_model), jnp.float32)
    pe = pe.at[:, 0::2].set(jnp.sin(ang))
    pe = pe.at[:, 1::2].set(jnp.cos(ang))
    return pe


# ---- deterministic parameter init (matmul weights stored in bf16) ----------

def _init_linear(key, din, dout):
    w = (jax.random.normal(key, (din, dout), jnp.float32) * 0.02).astype(jnp.bfloat16)
    return dict(w=w, b=jnp.zeros((dout,), jnp.float32))


def _init_ln(d):
    return dict(gamma=jnp.ones((d,), jnp.float32), beta=jnp.zeros((d,), jnp.float32))


def _init_mha(key, d):
    kq, kk, kv, ko = jax.random.split(key, 4)
    s = 0.02
    w_k = jax.random.normal(kk, (d, d), jnp.float32) * s
    w_v = jax.random.normal(kv, (d, d), jnp.float32) * s
    return dict(
        w_q=(jax.random.normal(kq, (d, d), jnp.float32) * s).astype(jnp.bfloat16),
        b_q=jnp.zeros((d,), jnp.float32),
        w_kv=jnp.concatenate([w_k, w_v], axis=1).astype(jnp.bfloat16),
        b_kv=jnp.zeros((2 * d,), jnp.float32),
        w_o=(jax.random.normal(ko, (d, d), jnp.float32) * s).astype(jnp.bfloat16),
        b_o=jnp.zeros((d,), jnp.float32))


def init_params(key, cfg):
    d, dff, V = cfg["d_model"], cfg["dim_feedforward"], cfg["vocab_size"]
    k_emb, k_enc, k_dec, k_f1, k_f2 = jax.random.split(key, 5)
    params = {"embed": jax.random.normal(k_emb, (V, d), jnp.float32) * 0.02}

    enc_layers = []
    for k in jax.random.split(k_enc, cfg["enc_num_layers"]):
        k1, k2, k3 = jax.random.split(k, 3)
        enc_layers.append(dict(self_attn=_init_mha(k1, d),
                               lin1=_init_linear(k2, d, dff),
                               lin2=_init_linear(k3, dff, d),
                               norm1=_init_ln(d), norm2=_init_ln(d)))
    params["encoder"] = dict(layers=enc_layers, norm=_init_ln(d))

    dec_layers = []
    for k in jax.random.split(k_dec, cfg["dec_num_layers"]):
        k1, k2, k3, k4 = jax.random.split(k, 4)
        dec_layers.append(dict(self_attn=_init_mha(k1, d),
                               cross_attn=_init_mha(k2, d),
                               lin1=_init_linear(k3, d, dff),
                               lin2=_init_linear(k4, dff, d),
                               norm1=_init_ln(d), norm2=_init_ln(d), norm3=_init_ln(d)))
    params["decoder"] = dict(layers=dec_layers, norm=_init_ln(d))

    params["last_ff"] = dict(lin1=_init_linear(k_f1, d, dff),
                             lin2=_init_linear(k_f2, dff, V))
    params["pemat"] = positional_embedding(cfg["max_sequence_length"], d)
    return params


# ---- full forward ----------------------------------------------------------

def transformer_forward(params, cfg, src_ids, tgt_ids,
                        encoder_output_only=False, inference=False, encoder_output=None):
    assert int(inference) + int(encoder_output is None) == 1
    nhead, norm_first = cfg["nhead"], cfg["norm_first"]
    B, Ss = src_ids.shape
    _, St = tgt_ids.shape
    # NOTE: dropout p = 0.0 in configs -> identity; omitted.

    src_pad_bias = pad_bias_from_ids(src_ids)          # (B, 1, Ss)

    if not inference:
        # Embedding lookup + positional add stays in plain JAX (XLA gather).
        x = params["embed"][src_ids] + params["pemat"][None, :Ss]
        for lp in params["encoder"]["layers"]:
            x = attn_block_pallas(x, x, src_pad_bias, lp["self_attn"], lp["norm1"],
                                  nhead=nhead, causal=False, is_self=True,
                                  norm_first=norm_first)
            x = ffn_block_pallas(x, lp["lin1"], lp["lin2"], lp["norm2"],
                                 norm_first=norm_first)
        encoder_output = layernorm_pallas(x, params["encoder"]["norm"])
        if encoder_output_only:
            return encoder_output

    tgt_pad_bias = pad_bias_from_ids(tgt_ids)          # (B, 1, St)
    y = params["embed"][tgt_ids] + params["pemat"][None, :St]
    for lp in params["decoder"]["layers"]:
        y = attn_block_pallas(y, y, tgt_pad_bias, lp["self_attn"], lp["norm1"],
                              nhead=nhead, causal=True, is_self=True,
                              norm_first=norm_first)
        y = attn_block_pallas(y, encoder_output, src_pad_bias, lp["cross_attn"],
                              lp["norm2"], nhead=nhead, causal=False, is_self=False,
                              norm_first=norm_first)
        y = ffn_block_pallas(y, lp["lin1"], lp["lin2"], lp["norm3"],
                             norm_first=norm_first)

    logits = final_head_pallas(y, params["decoder"]["norm"],
                               params["last_ff"]["lin1"], params["last_ff"]["lin2"])
    return dict(encoder_output=encoder_output, decoder_output=logits)


# --------------------------------------------------------------------------

if __name__ == "__main__":
    configs = dict(d_model=32, vocab_size=50, dim_feedforward=64, nhead=4,
                   dropout=0.0, batch_first=True, norm_first=False,
                   max_sequence_length=16, enc_num_layers=2, dec_num_layers=2)

    key = jax.random.PRNGKey(0)
    k_p, k_src, k_tgt = jax.random.split(key, 3)
    params = init_params(k_p, configs)

    B, S = 2, 8
    src_ids = jax.random.randint(k_src, (B, S), 1, configs["vocab_size"], dtype=jnp.int32)
    tgt_ids = jax.random.randint(k_tgt, (B, S), 1, configs["vocab_size"], dtype=jnp.int32)
    # introduce some padding (id 0) at the tail to exercise key-padding masks
    src_ids = src_ids.at[1, -2:].set(0)
    tgt_ids = tgt_ids.at[0, -1:].set(0)

    out = transformer_forward(params, configs, src_ids, tgt_ids)
    jax.block_until_ready(out["decoder_output"])
    jax.block_until_ready(out["encoder_output"])

    assert out["encoder_output"].shape == (B, S, configs["d_model"])
    assert out["decoder_output"].shape == (B, S, configs["vocab_size"])
    assert bool(jnp.all(jnp.isfinite(out["encoder_output"])))
    assert bool(jnp.all(jnp.isfinite(out["decoder_output"])))
    print("KERNEL_OK")
</pallas_src>

<mosaic_0001>
module attributes {stable_mosaic.version = 11 : i64} {
  func.func @kernel(%arg0: i32, %arg1: memref<1x8x32xf32, #tpu.memory_space<vmem>>, %arg2: memref<1x8x32xf32, #tpu.memory_space<vmem>>, %arg3: memref<1x1x8xf32, #tpu.memory_space<vmem>>, %arg4: memref<32x32xbf16, #tpu.memory_space<vmem>>, %arg5: memref<1x32xf32, #tpu.memory_space<vmem>>, %arg6: memref<32x64xbf16, #tpu.memory_space<vmem>>, %arg7: memref<1x64xf32, #tpu.memory_space<vmem>>, %arg8: memref<32x32xbf16, #tpu.memory_space<vmem>>, %arg9: memref<1x32xf32, #tpu.memory_space<vmem>>, %arg10: memref<1x32xf32, #tpu.memory_space<vmem>>, %arg11: memref<1x32xf32, #tpu.memory_space<vmem>>, %arg12: memref<1x8x32xf32, #tpu.memory_space<vmem>>) attributes {dimension_semantics = [#tpu.dimension_semantics<parallel>], iteration_bounds = array<i64: 2>, scalar_prefetch = 0 : i64, scratch_operands = 0 : i64, tpu.core_type = #tpu.core_type<tc>, window_params = [{transform_indices = @transform_0, window_bounds = array<i64: 1, 8, 32>}, {transform_indices = @transform_1, window_bounds = array<i64: 1, 8, 32>}, {transform_indices = @transform_2, window_bounds = array<i64: 1, 1, 8>}, {pipeline_mode = #tpu.pipeline_mode<synchronous>, transform_indices = @transform_3, window_bounds = array<i64: 32, 32>}, {pipeline_mode = #tpu.pipeline_mode<synchronous>, transform_indices = @transform_4, window_bounds = array<i64: 1, 32>}, {pipeline_mode = #tpu.pipeline_mode<synchronous>, transform_indices = @transform_5, window_bounds = array<i64: 32, 64>}, {pipeline_mode = #tpu.pipeline_mode<synchronous>, transform_indices = @transform_6, window_bounds = array<i64: 1, 64>}, {pipeline_mode = #tpu.pipeline_mode<synchronous>, transform_indices = @transform_7, window_bounds = array<i64: 32, 32>}, {pipeline_mode = #tpu.pipeline_mode<synchronous>, transform_indices = @transform_8, window_bounds = array<i64: 1, 32>}, {pipeline_mode = #tpu.pipeline_mode<synchronous>, transform_indices = @transform_9, window_bounds = array<i64: 1, 32>}, {pipeline_mode = #tpu.pipeline_mode<synchronous>, transform_indices = @transform_10, window_bounds = array<i64: 1, 32>}, {transform_indices = @transform_11, window_bounds = array<i64: 1, 8, 32>}]} {
    %c0 = arith.constant 0 : index
    %c0_0 = arith.constant 0 : index
    %c0_1 = arith.constant 0 : index
    %0 = vector.load %arg1[%c0, %c0_0, %c0_1] : memref<1x8x32xf32, #tpu.memory_space<vmem>>, vector<1x8x32xf32>
    %1 = vector.shape_cast %0 : vector<1x8x32xf32> to vector<8x32xf32>
    %c0_2 = arith.constant 0 : index
    %c0_3 = arith.constant 0 : index
    %c0_4 = arith.constant 0 : index
    %2 = vector.load %arg2[%c0_2, %c0_3, %c0_4] : memref<1x8x32xf32, #tpu.memory_space<vmem>>, vector<1x8x32xf32>
    %3 = vector.shape_cast %2 : vector<1x8x32xf32> to vector<8x32xf32>
    %c0_5 = arith.constant 0 : index
    %c0_6 = arith.constant 0 : index
    %4 = vector.load %arg10[%c0_5, %c0_6] : memref<1x32xf32, #tpu.memory_space<vmem>>, vector<1x32xf32>
    %c0_7 = arith.constant 0 : index
    %c0_8 = arith.constant 0 : index
    %5 = vector.load %arg11[%c0_7, %c0_8] : memref<1x32xf32, #tpu.memory_space<vmem>>, vector<1x32xf32>
    %6 = arith.truncf %1 : vector<8x32xf32> to vector<8x32xbf16>
    %c0_9 = arith.constant 0 : index
    %c0_10 = arith.constant 0 : index
    %7 = vector.load %arg4[%c0_9, %c0_10] : memref<32x32xbf16, #tpu.memory_space<vmem>>, vector<32x32xbf16>
    %cst = arith.constant dense<0.000000e+00> : vector<8x32xf32>
    %8 = tpu.matmul %6, %7, %cst {dimension_numbers = #tpu.dot_dimension_numbers<[1], [0], [0], [1], [0, 0, 1, 1], [], []>} : vector<8x32xbf16>, vector<32x32xbf16>, vector<8x32xf32> -> vector<8x32xf32>
    %c0_11 = arith.constant 0 : index
    %c0_12 = arith.constant 0 : index
    %9 = vector.load %arg5[%c0_11, %c0_12] : memref<1x32xf32, #tpu.memory_space<vmem>>, vector<1x32xf32>
    %10 = vector.broadcast %9 : vector<1x32xf32> to vector<8x32xf32>
    %11 = arith.addf %8, %10 : vector<8x32xf32>
    %12 = arith.truncf %3 : vector<8x32xf32> to vector<8x32xbf16>
    %c0_13 = arith.constant 0 : index
    %c0_14 = arith.constant 0 : index
    %13 = vector.load %arg6[%c0_13, %c0_14] : memref<32x64xbf16, #tpu.memory_space<vmem>>, vector<32x64xbf16>
    %cst_15 = arith.constant dense<0.000000e+00> : vector<8x64xf32>
    %14 = tpu.matmul %12, %13, %cst_15 {dimension_numbers = #tpu.dot_dimension_numbers<[1], [0], [0], [1], [0, 0, 1, 1], [], []>} : vector<8x32xbf16>, vector<32x64xbf16>, vector<8x64xf32> -> vector<8x64xf32>
    %c0_16 = arith.constant 0 : index
    %c0_17 = arith.constant 0 : index
    %15 = vector.load %arg7[%c0_16, %c0_17] : memref<1x64xf32, #tpu.memory_space<vmem>>, vector<1x64xf32>
    %16 = vector.broadcast %15 : vector<1x64xf32> to vector<8x64xf32>
    %17 = arith.addf %14, %16 : vector<8x64xf32>
    %18 = vector.extract_strided_slice %17 {offsets = [0, 0], sizes = [8, 32], strides = [1, 1]} : vector<8x64xf32> to vector<8x32xf32>
    %19 = vector.extract_strided_slice %17 {offsets = [0, 32], sizes = [8, 32], strides = [1, 1]} : vector<8x64xf32> to vector<8x32xf32>
    %c0_18 = arith.constant 0 : index
    %c0_19 = arith.constant 0 : index
    %c0_20 = arith.constant 0 : index
    %20 = vector.load %arg3[%c0_18, %c0_19, %c0_20] : memref<1x1x8xf32, #tpu.memory_space<vmem>>, vector<1x1x8xf32>
    %21 = vector.shape_cast %20 : vector<1x1x8xf32> to vector<1x8xf32>
    %22 = vector.extract_strided_slice %11 {offsets = [0, 0], sizes = [8, 8], strides = [1, 1]} : vector<8x32xf32> to vector<8x8xf32>
    %23 = vector.extract_strided_slice %18 {offsets = [0, 0], sizes = [8, 8], strides = [1, 1]} : vector<8x32xf32> to vector<8x8xf32>
    %24 = vector.extract_strided_slice %19 {offsets = [0, 0], sizes = [8, 8], strides = [1, 1]} : vector<8x32xf32> to vector<8x8xf32>
    %25 = tpu.transpose %23, [1, 0] : vector<8x8xf32> -> vector<8x8xf32>
    %cst_21 = arith.constant dense<0.000000e+00> : vector<8x8xf32>
    %26 = tpu.matmul %22, %25, %cst_21 {dimension_numbers = #tpu.dot_dimension_numbers<[1], [0], [0], [1], [0, 0, 1, 1], [], []>} : vector<8x8xf32>, vector<8x8xf32>, vector<8x8xf32> -> vector<8x8xf32>
    %cst_22 = arith.constant 0.353553385 : f32
    %27 = vector.broadcast %cst_22 : f32 to vector<8x8xf32>
    %28 = arith.mulf %26, %27 : vector<8x8xf32>
    %29 = vector.broadcast %21 : vector<1x8xf32> to vector<8x8xf32>
    %30 = arith.addf %28, %29 : vector<8x8xf32>
    %cst_23 = arith.constant dense<0xFF800000> : vector<8xf32>
    %31 = vector.multi_reduction <maximumf>, %30, %cst_23 [1] : vector<8x8xf32> to vector<8xf32>
    %32 = vector.shape_cast %31 : vector<8xf32> to vector<8x1xf32>
    %33 = vector.broadcast %32 : vector<8x1xf32> to vector<8x8xf32>
    %34 = arith.subf %30, %33 : vector<8x8xf32>
    %35 = math.exp %34 : vector<8x8xf32>
    %cst_24 = arith.constant dense<0.000000e+00> : vector<8xf32>
    %36 = vector.multi_reduction <add>, %35, %cst_24 [1] : vector<8x8xf32> to vector<8xf32>
    %37 = vector.shape_cast %36 : vector<8xf32> to vector<8x1xf32>
    %38 = tpu.reciprocal %37 {approx = true} : vector<8x1xf32> -> vector<8x1xf32>
    %39 = vector.broadcast %38 : vector<8x1xf32> to vector<8x8xf32>
    %40 = arith.mulf %35, %39 : vector<8x8xf32>
    %cst_25 = arith.constant dense<0.000000e+00> : vector<8x8xf32>
    %41 = tpu.matmul %40, %24, %cst_25 {dimension_numbers = #tpu.dot_dimension_numbers<[1], [0], [0], [1], [0, 0, 1, 1], [], []>} : vector<8x8xf32>, vector<8x8xf32>, vector<8x8xf32> -> vector<8x8xf32>
    %42 = vector.extract_strided_slice %11 {offsets = [0, 8], sizes = [8, 8], strides = [1, 1]} : vector<8x32xf32> to vector<8x8xf32>
    %43 = vector.extract_strided_slice %18 {offsets = [0, 8], sizes = [8, 8], strides = [1, 1]} : vector<8x32xf32> to vector<8x8xf32>
    %44 = vector.extract_strided_slice %19 {offsets = [0, 8], sizes = [8, 8], strides = [1, 1]} : vector<8x32xf32> to vector<8x8xf32>
    %45 = tpu.transpose %43, [1, 0] : vector<8x8xf32> -> vector<8x8xf32>
    %cst_26 = arith.constant dense<0.000000e+00> : vector<8x8xf32>
    %46 = tpu.matmul %42, %45, %cst_26 {dimension_numbers = #tpu.dot_dimension_numbers<[1], [0], [0], [1], [0, 0, 1, 1], [], []>} : vector<8x8xf32>, vector<8x8xf32>, vector<8x8xf32> -> vector<8x8xf32>
    %cst_27 = arith.constant 0.353553385 : f32
    %47 = vector.broadcast %cst_27 : f32 to vector<8x8xf32>
    %48 = arith.mulf %46, %47 : vector<8x8xf32>
    %49 = vector.broadcast %21 : vector<1x8xf32> to vector<8x8xf32>
    %50 = arith.addf %48, %49 : vector<8x8xf32>
    %cst_28 = arith.constant dense<0xFF800000> : vector<8xf32>
    %51 = vector.multi_reduction <maximumf>, %50, %cst_28 [1] : vector<8x8xf32> to vector<8xf32>
    %52 = vector.shape_cast %51 : vector<8xf32> to vector<8x1xf32>
    %53 = vector.broadcast %52 : vector<8x1xf32> to vector<8x8xf32>
    %54 = arith.subf %50, %53 : vector<8x8xf32>
    %55 = math.exp %54 : vector<8x8xf32>
    %cst_29 = arith.constant dense<0.000000e+00> : vector<8xf32>
    %56 = vector.multi_reduction <add>, %55, %cst_29 [1] : vector<8x8xf32> to vector<8xf32>
    %57 = vector.shape_cast %56 : vector<8xf32> to vector<8x1xf32>
    %58 = tpu.reciprocal %57 {approx = true} : vector<8x1xf32> -> vector<8x1xf32>
    %59 = vector.broadcast %58 : vector<8x1xf32> to vector<8x8xf32>
    %60 = arith.mulf %55, %59 : vector<8x8xf32>
    %cst_30 = arith.constant dense<0.000000e+00> : vector<8x8xf32>
    %61 = tpu.matmul %60, %44, %cst_30 {dimension_numbers = #tpu.dot_dimension_numbers<[1], [0], [0], [1], [0, 0, 1, 1], [], []>} : vector<8x8xf32>, vector<8x8xf32>, vector<8x8xf32> -> vector<8x8xf32>
    %62 = vector.extract_strided_slice %11 {offsets = [0, 16], sizes = [8, 8], strides = [1, 1]} : vector<8x32xf32> to vector<8x8xf32>
    %63 = vector.extract_strided_slice %18 {offsets = [0, 16], sizes = [8, 8], strides = [1, 1]} : vector<8x32xf32> to vector<8x8xf32>
    %64 = vector.extract_strided_slice %19 {offsets = [0, 16], sizes = [8, 8], strides = [1, 1]} : vector<8x32xf32> to vector<8x8xf32>
    %65 = tpu.transpose %63, [1, 0] : vector<8x8xf32> -> vector<8x8xf32>
    %cst_31 = arith.constant dense<0.000000e+00> : vector<8x8xf32>
    %66 = tpu.matmul %62, %65, %cst_31 {dimension_numbers = #tpu.dot_dimension_numbers<[1], [0], [0], [1], [0, 0, 1, 1], [], []>} : vector<8x8xf32>, vector<8x8xf32>, vector<8x8xf32> -> vector<8x8xf32>
    %cst_32 = arith.constant 0.353553385 : f32
    %67 = vector.broadcast %cst_32 : f32 to vector<8x8xf32>
    %68 = arith.mulf %66, %67 : vector<8x8xf32>
    %69 = vector.broadcast %21 : vector<1x8xf32> to vector<8x8xf32>
    %70 = arith.addf %68, %69 : vector<8x8xf32>
    %cst_33 = arith.constant dense<0xFF800000> : vector<8xf32>
    %71 = vector.multi_reduction <maximumf>, %70, %cst_33 [1] : vector<8x8xf32> to vector<8xf32>
    %72 = vector.shape_cast %71 : vector<8xf32> to vector<8x1xf32>
    %73 = vector.broadcast %72 : vector<8x1xf32> to vector<8x8xf32>
    %74 = arith.subf %70, %73 : vector<8x8xf32>
    %75 = math.exp %74 : vector<8x8xf32>
    %cst_34 = arith.constant dense<0.000000e+00> : vector<8xf32>
    %76 = vector.multi_reduction <add>, %75, %cst_34 [1] : vector<8x8xf32> to vector<8xf32>
    %77 = vector.shape_cast %76 : vector<8xf32> to vector<8x1xf32>
    %78 = tpu.reciprocal %77 {approx = true} : vector<8x1xf32> -> vector<8x1xf32>
    %79 = vector.broadcast %78 : vector<8x1xf32> to vector<8x8xf32>
    %80 = arith.mulf %75, %79 : vector<8x8xf32>
    %cst_35 = arith.constant dense<0.000000e+00> : vector<8x8xf32>
    %81 = tpu.matmul %80, %64, %cst_35 {dimension_numbers = #tpu.dot_dimension_numbers<[1], [0], [0], [1], [0, 0, 1, 1], [], []>} : vector<8x8xf32>, vector<8x8xf32>, vector<8x8xf32> -> vector<8x8xf32>
    %82 = vector.extract_strided_slice %11 {offsets = [0, 24], sizes = [8, 8], strides = [1, 1]} : vector<8x32xf32> to vector<8x8xf32>
    %83 = vector.extract_strided_slice %18 {offsets = [0, 24], sizes = [8, 8], strides = [1, 1]} : vector<8x32xf32> to vector<8x8xf32>
    %84 = vector.extract_strided_slice %19 {offsets = [0, 24], sizes = [8, 8], strides = [1, 1]} : vector<8x32xf32> to vector<8x8xf32>
    %85 = tpu.transpose %83, [1, 0] : vector<8x8xf32> -> vector<8x8xf32>
    %cst_36 = arith.constant dense<0.000000e+00> : vector<8x8xf32>
    %86 = tpu.matmul %82, %85, %cst_36 {dimension_numbers = #tpu.dot_dimension_numbers<[1], [0], [0], [1], [0, 0, 1, 1], [], []>} : vector<8x8xf32>, vector<8x8xf32>, vector<8x8xf32> -> vector<8x8xf32>
    %cst_37 = arith.constant 0.353553385 : f32
    %87 = vector.broadcast %cst_37 : f32 to vector<8x8xf32>
    %88 = arith.mulf %86, %87 : vector<8x8xf32>
    %89 = vector.broadcast %21 : vector<1x8xf32> to vector<8x8xf32>
    %90 = arith.addf %88, %89 : vector<8x8xf32>
    %cst_38 = arith.constant dense<0xFF800000> : vector<8xf32>
    %91 = vector.multi_reduction <maximumf>, %90, %cst_38 [1] : vector<8x8xf32> to vector<8xf32>
    %92 = vector.shape_cast %91 : vector<8xf32> to vector<8x1xf32>
    %93 = vector.broadcast %92 : vector<8x1xf32> to vector<8x8xf32>
    %94 = arith.subf %90, %93 : vector<8x8xf32>
    %95 = math.exp %94 : vector<8x8xf32>
    %cst_39 = arith.constant dense<0.000000e+00> : vector<8xf32>
    %96 = vector.multi_reduction <add>, %95, %cst_39 [1] : vector<8x8xf32> to vector<8xf32>
    %97 = vector.shape_cast %96 : vector<8xf32> to vector<8x1xf32>
    %98 = tpu.reciprocal %97 {approx = true} : vector<8x1xf32> -> vector<8x1xf32>
    %99 = vector.broadcast %98 : vector<8x1xf32> to vector<8x8xf32>
    %100 = arith.mulf %95, %99 : vector<8x8xf32>
    %cst_40 = arith.constant dense<0.000000e+00> : vector<8x8xf32>
    %101 = tpu.matmul %100, %84, %cst_40 {dimension_numbers = #tpu.dot_dimension_numbers<[1], [0], [0], [1], [0, 0, 1, 1], [], []>} : vector<8x8xf32>, vector<8x8xf32>, vector<8x8xf32> -> vector<8x8xf32>
    %102 = tpu.concatenate %41, %61, %81, %101 in 1 : vector<8x8xf32>, vector<8x8xf32>, vector<8x8xf32>, vector<8x8xf32> -> vector<8x32xf32>
    %103 = arith.truncf %102 : vector<8x32xf32> to vector<8x32xbf16>
    %c0_41 = arith.constant 0 : index
    %c0_42 = arith.constant 0 : index
    %104 = vector.load %arg8[%c0_41, %c0_42] : memref<32x32xbf16, #tpu.memory_space<vmem>>, vector<32x32xbf16>
    %cst_43 = arith.constant dense<0.000000e+00> : vector<8x32xf32>
    %105 = tpu.matmul %103, %104, %cst_43 {dimension_numbers = #tpu.dot_dimension_numbers<[1], [0], [0], [1], [0, 0, 1, 1], [], []>} : vector<8x32xbf16>, vector<32x32xbf16>, vector<8x32xf32> -> vector<8x32xf32>
    %c0_44 = arith.constant 0 : index
    %c0_45 = arith.constant 0 : index
    %106 = vector.load %arg9[%c0_44, %c0_45] : memref<1x32xf32, #tpu.memory_space<vmem>>, vector<1x32xf32>
    %107 = vector.broadcast %106 : vector<1x32xf32> to vector<8x32xf32>
    %108 = arith.addf %105, %107 : vector<8x32xf32>
    %109 = arith.addf %1, %108 : vector<8x32xf32>
    %cst_46 = arith.constant dense<0.000000e+00> : vector<8xf32>
    %110 = vector.multi_reduction <add>, %109, %cst_46 [1] : vector<8x32xf32> to vector<8xf32>
    %111 = vector.shape_cast %110 : vector<8xf32> to vector<8x1xf32>
    %cst_47 = arith.constant 3.200000e+01 : f32
    %112 = vector.broadcast %cst_47 : f32 to vector<8x1xf32>
    %113 = arith.divf %111, %112 : vector<8x1xf32>
    %114 = vector.broadcast %113 : vector<8x1xf32> to vector<8x32xf32>
    %115 = arith.subf %109, %114 : vector<8x32xf32>
    %116 = arith.mulf %115, %115 : vector<8x32xf32>
    %cst_48 = arith.constant dense<0.000000e+00> : vector<8xf32>
    %117 = vector.multi_reduction <add>, %116, %cst_48 [1] : vector<8x32xf32> to vector<8xf32>
    %118 = vector.shape_cast %117 : vector<8xf32> to vector<8x1xf32>
    %cst_49 = arith.constant 3.200000e+01 : f32
    %119 = vector.broadcast %cst_49 : f32 to vector<8x1xf32>
    %120 = arith.divf %118, %119 : vector<8x1xf32>
    %121 = vector.broadcast %113 : vector<8x1xf32> to vector<8x32xf32>
    %122 = arith.subf %109, %121 : vector<8x32xf32>
    %cst_50 = arith.constant 9.99999974E-6 : f32
    %123 = vector.broadcast %cst_50 : f32 to vector<8x1xf32>
    %124 = arith.addf %120, %123 : vector<8x1xf32>
    %125 = math.rsqrt %124 : vector<8x1xf32>
    %126 = vector.broadcast %125 : vector<8x1xf32> to vector<8x32xf32>
    %127 = arith.mulf %122, %126 : vector<8x32xf32>
    %128 = vector.broadcast %4 : vector<1x32xf32> to vector<8x32xf32>
    %129 = arith.mulf %127, %128 : vector<8x32xf32>
    %130 = vector.broadcast %5 : vector<1x32xf32> to vector<8x32xf32>
    %131 = arith.addf %129, %130 : vector<8x32xf32>
    %c0_51 = arith.constant 0 : index
    %c0_52 = arith.constant 0 : index
    %c0_53 = arith.constant 0 : index
    %132 = vector.load %arg12[%c0_51, %c0_52, %c0_53] : memref<1x8x32xf32, #tpu.memory_space<vmem>>, vector<1x8x32xf32>
    %133 = vector.shape_cast %132 : vector<1x8x32xf32> to vector<8x32xf32>
    %134 = vector.shape_cast %131 : vector<8x32xf32> to vector<1x8x32xf32>
    tpu.vector_store %arg12[%c0_51, %c0_52, %c0_53], %134 {strides = array<i32>} : memref<1x8x32xf32, #tpu.memory_space<vmem>>, vector<1x8x32xf32>,
    return
  }
  func.func @transform_0(%arg0: i32) -> (i32, i32, i32) {
    %c0_i32 = arith.constant 0 : i32
    %c0_i32_0 = arith.constant 0 : i32
    %c0_i32_1 = arith.constant 0 : i32
    return %arg0, %c0_i32, %c0_i32_0 : i32, i32, i32
  }
  func.func @transform_1(%arg0: i32) -> (i32, i32, i32) {
    %c0_i32 = arith.constant 0 : i32
    %c0_i32_0 = arith.constant 0 : i32
    %c0_i32_1 = arith.constant 0 : i32
    return %arg0, %c0_i32, %c0_i32_0 : i32, i32, i32
  }
  func.func @transform_2(%arg0: i32) -> (i32, i32, i32) {
    %c0_i32 = arith.constant 0 : i32
    %c0_i32_0 = arith.constant 0 : i32
    %c0_i32_1 = arith.constant 0 : i32
    return %arg0, %c0_i32, %c0_i32_0 : i32, i32, i32
  }
  func.func @transform_3(%arg0: i32) -> (i32, i32) {
    %c0_i32 = arith.constant 0 : i32
    %c0_i32_0 = arith.constant 0 : i32
    %c0_i32_1 = arith.constant 0 : i32
    return %c0_i32, %c0_i32_0 : i32, i32
  }
  func.func @transform_4(%arg0: i32) -> (i32, i32) {
    %c0_i32 = arith.constant 0 : i32
    %c0_i32_0 = arith.constant 0 : i32
    %c0_i32_1 = arith.constant 0 : i32
    return %c0_i32, %c0_i32_0 : i32, i32
  }
  func.func @transform_5(%arg0: i32) -> (i32, i32) {
    %c0_i32 = arith.constant 0 : i32
    %c0_i32_0 = arith.constant 0 : i32
    %c0_i32_1 = arith.constant 0 : i32
    return %c0_i32, %c0_i32_0 : i32, i32
  }
  func.func @transform_6(%arg0: i32) -> (i32, i32) {
    %c0_i32 = arith.constant 0 : i32
    %c0_i32_0 = arith.constant 0 : i32
    %c0_i32_1 = arith.constant 0 : i32
    return %c0_i32, %c0_i32_0 : i32, i32
  }
  func.func @transform_7(%arg0: i32) -> (i32, i32) {
    %c0_i32 = arith.constant 0 : i32
    %c0_i32_0 = arith.constant 0 : i32
    %c0_i32_1 = arith.constant 0 : i32
    return %c0_i32, %c0_i32_0 : i32, i32
  }
  func.func @transform_8(%arg0: i32) -> (i32, i32) {
    %c0_i32 = arith.constant 0 : i32
    %c0_i32_0 = arith.constant 0 : i32
    %c0_i32_1 = arith.constant 0 : i32
    return %c0_i32, %c0_i32_0 : i32, i32
  }
  func.func @transform_9(%arg0: i32) -> (i32, i32) {
    %c0_i32 = arith.constant 0 : i32
    %c0_i32_0 = arith.constant 0 : i32
    %c0_i32_1 = arith.constant 0 : i32
    return %c0_i32, %c0_i32_0 : i32, i32
  }
  func.func @transform_10(%arg0: i32) -> (i32, i32) {
    %c0_i32 = arith.constant 0 : i32
    %c0_i32_0 = arith.constant 0 : i32
    %c0_i32_1 = arith.constant 0 : i32
    return %c0_i32, %c0_i32_0 : i32, i32
  }
  func.func @transform_11(%arg0: i32) -> (i32, i32, i32) {
    %c0_i32 = arith.constant 0 : i32
    %c0_i32_0 = arith.constant 0 : i32
    %c0_i32_1 = arith.constant 0 : i32
    return %arg0, %c0_i32, %c0_i32_0 : i32, i32, i32
  }
}

</mosaic_0001>

<bundles_post_ra>
// kernel: tpu_custom_call.1
= control target key start
LH: loop header
LB: loop body
LE: loop exit
PB: predicated region body
PF: predicated region fallthrough
CT: control target
= control target key end

     0   :  { %s1936_s0 = inlined_call_operand.hbm [shape: f32[2,8,32], index: 0, kind: input, shape index: {}]   ;;  %s1937_s1 = inlined_call_operand.hbm [shape: f32[2,8,32], index: 1, kind: input, shape index: {}]   ;;  %s1938_s2 = inlined_call_operand.hbm [shape: f32[2,1,8], index: 2, kind: input, shape index: {}]   ;;  %s1939_s3 = inlined_call_operand.hbm [shape: bf16[32,32], index: 3, kind: input, shape index: {}]   ;;  %s1940_s4 = inlined_call_operand.vmem [shape: f32[1,32], index: 4, kind: input, shape index: {}]   ;;  %s1941_s5 = inlined_call_operand.hbm [shape: bf16[32,64], index: 5, kind: input, shape index: {}]   ;;  %s1942_s6 = inlined_call_operand.vmem [shape: f32[1,64], index: 6, kind: input, shape index: {}]   ;;  %s1943_s7 = inlined_call_operand.hbm [shape: bf16[32,32], index: 7, kind: input, shape index: {}]   ;;  %s1944_s8 = inlined_call_operand.vmem [shape: f32[1,32], index: 8, kind: input, shape index: {}]   ;;  %s1945_s9 = inlined_call_operand.vmem [shape: f32[1,32], index: 9, kind: input, shape index: {}]   ;;  %s1946_s10 = inlined_call_operand.vmem [shape: f32[1,32], index: 10, kind: input, shape index: {}]   ;;  %s1947_s11 = inlined_call_operand.hbm [shape: f32[2,8,32], index: 11, kind: output, shape index: {}]  }
   0x1   :  { %1962 = sst [smem:[#allocation25_spill]] %s1937_s1 }
   0x2   :  { %1963 = sst [smem:[#allocation26_spill]] %s1939_s3 }
   0x3   :  { %1964 = sst [smem:[#allocation27_spill]] %s1945_s9 }
   0x4   :  { %1965 = sst [smem:[#allocation28_spill]] %s1946_s10 }
   0x5   :  { %1966 = sst [smem:[#allocation29_spill]] %s1947_s11 }
   0x6   :  { %16 = vsyncpa [#allocation3], 0 }
   0x7   :  { %18 = vsyncpa [#allocation3 + $0x1], 0 }
   0x8   :  { %19 = vsyncpa [#allocation6], 0 }
   0x9   :  { %21 = vsyncpa [#allocation6 + $0x1], 0 }
   0xa   :  { %22 = vsyncpa [#allocation9], 0 }
   0xb   :  { %23 = vsyncpa [#allocation12], 0 }
   0xc   :  { %24 = vsyncpa [#allocation4], 0 }
   0xd   :  { %26 = vsyncpa [#allocation4 + $0x1], 0  ;;  %s1651_s17 = smov 0   ;;  %s1653_s18 = smov 0  }
   0xe   :  { %s1655_s19 = smov 0   ;;  %s1657_s20 = smov 0  }
   0xf LB: > { %1967 = sst [smem:[#allocation19_spill]] %s1561_s17  ;;  %s1675_s24 = sadd.s32 4294967295, %s1573_s20   ;;  %s1573_s20 = sphi %s1657_s20, %s1995_s20   ;;  %s1569_s19 = sphi %s1655_s19, %s1997_s19   ;;  %s1565_s18 = sphi %s1653_s18, %s1999_s18   ;;  %s1561_s17 = sphi %s1651_s17, %s1998_s17  }
  0x10   : > { %1968 = sst [smem:[#allocation20_spill]] %s1569_s19  ;;  %p1124_p0 = scmp.ge.s32.totalorder %s1573_s20, 1 }
  0x11   : > { %s1969_s3 = sld [smem:[#allocation26_spill]]  ;;  %p1961_p1 = scmp.eq.s32.totalorder %s1675_s24, 0 }
  0x12   : > { %p309_p2 = scmp.lt.s32.totalorder %s1573_s20, 3  ;;  %s1575_s26 = smov [#allocation8]  }
  0x13   : > { %s322_s27 = sshll.u32 %s1575_s26, 4  ;;  %s1948_s29 = smov 64   ;;  %s323_s27 = int_to_ptr.vmem [resolvable:$true] %s322_s27 }
  0x14   : > { %p1680_p3 = pnand %p1124_p0, %p309_p2  ;;  %s1950_s30 = smov 4  }
  0x15   : > { %s1123_s12 = sadd.s32 4294967294, %s1573_s20   ;;  %s1700_s13 = sadd.s32 1, %s1573_s20  }
  0x16   : > { %p1209_p4 = pneg %p1680_p3  ;;  %1972 = sst [smem:[#allocation21_spill]] %s1700_s13 }
  0x17   : > { %s320_s23 = sshll.u32 %s1969_s3, 4  ;;  %s39_s14 = sadd.s32 1, %s1569_s19  ;;  %s321_s23 = int_to_ptr.hbm [resolvable:$true] %s320_s23 }
  0x18   : > { %p1689_p6 = pnand %p1209_p4, %p1961_p1  ;;  %s36_s15 = ssub.s32 %s1573_s20, %s1700_s13 }
  0x19   : > { %p46_p7 = scmp.ne.s32.totalorder %s1569_s19, %s1565_s18  ;;  %p37_p8 = scmp.eq.s32.totalorder %s36_s15, 0 }
  0x1a   : > { %1212 = dma.hbm_to_vmem [thread:$0]  (!%p1689_p6), %s321_s23, 256, %s323_s27, [#allocation9], %s1948_s29, %s1948_s29, %s1950_s30  }
  0x1b   : > { %p47_p9 = scmp.eq.s32.totalorder %s1573_s20, 0  ;;  %p52_p10 = scmp.ne.s32.totalorder %s1565_s18, %s1561_s17 }
  0x1c   : > { %p296_p11 = scmp.eq.s32.totalorder %s1675_s24, 1  ;;  %p302_p2 = scmp.eq.s32.totalorder %s1123_s12, 1 }
  0x1d   : > { %s1712_s16 = scalar_select %p37_p8, %s1569_s19, %s39_s14  }
  0x1e   : > { %p48_p12 = por %p47_p9, %p46_p7  ;;  %p1716_p13 = por %p1961_p1, %p52_p10 }
  0x1f   : > { %1973 = sst [smem:[#allocation22_spill]] %s1712_s16  ;;  %p1720_p0 = por %p296_p11, %p46_p7 }
  0x20   : > { %p1236_p4 = scmp.lt.s32.totalorder %s1573_s20, 2  ;;  %s1726_s23 = sand.u32 1, %s1569_s19  }
  0x21   : > { %s1975_s22 = scalar_select %p1720_p0, 1, 0 }
  0x22   : > { %p1728_p5 = por %p302_p2, %p52_p10  ;;  %s1960_s27 = sshll.u32 %s1726_s23, 3 }
  0x23   : > { %1976 = sst [smem:[#allocation23_spill]] %s1975_s22  ;;  %s1130_s14 = sshll.u32 %s1573_s20, 3 }
  0x24   : > { %s1977_s26 = scalar_select %p1728_p5, 1, 0 }
  0x25   : > { %p1734_p8 = pnand %p1236_p4, %p48_p12  ;;  %s398_s29 = sand.u32 1, %s1573_s20  }
  0x26   : > { %1978 = sst [smem:[#allocation24_spill]] %s1977_s26  ;;  %s402_s16 = scalar_lea.vmem [#allocation5], %s1960_s27 }
  0x27   : > { %s1980_s1 = sld [smem:[#allocation25_spill]]  ;;  %s410_s19 = sshll.u32 %s402_s16, 4  ;;  %s411_s19 = int_to_ptr.vmem [resolvable:$true] %s410_s19 }
  0x28   : > { %s337_s10 = sshll.u32 %s1941_s5, 4  ;;  %s1749_s22 = scalar_lea.sflag [#allocation6], %s398_s29  ;;  %s338_s10 = int_to_ptr.hbm [resolvable:$true] %s337_s10 }
  0x29   : > { %p1349_p9 = pneg %p1734_p8 }
  0x2d   : > { %s406_s3 = scalar_lea.hbm %s1980_s1, %s1130_s14  ;;  %s1352_s16 = scalar_lea.hbm %s1980_s1, 16 }
  0x2e   : > { %s408_s13 = sshll.u32 %s406_s3, 4  ;;  %s409_s13 = int_to_ptr.hbm [resolvable:$true] %s408_s13 }
  0x2f   : > { %s1345_s11 = sshra.s32 %s409_s13, 4  ;;  %s1346_s11 = int_to_ptr.hbm [resolvable:$true] %s1345_s11 }
  0x30   : > { %s1347_s9 = scalar_lea.hbm %s1346_s11, 8  ;;  %p1353_p12 = scmp.lt.s32.totalorder %s1346_s11, %s1980_s1 }
  0x31   : > { %p1348_p7 = scmp.ne.s32.totalorder %s1346_s11, %s1347_s9  ;;  %p1354_p2 = scmp.lt.s32.totalorder %s1352_s16, %s1347_s9 }
  0x33   : > { %p1350_p10 = pnand %p1349_p9, %p1348_p7  ;;  %p1355_p4 = por %p1354_p2, %p1353_p12 }
  0x35   : > { %p1351_p11 = pneg %p1350_p10 }
  0x37   : > { %p1356_p1 = pnand %p1355_p4, %p1351_p11 }
  0x39   : > { %1359 = shalt.err (!%p1356_p1)
}
  0x3a   : > { %1225 = dma.hbm_to_vmem [thread:$0]  (!%p1734_p8), %s409_s13, 128, %s411_s19, %s1749_s22  }
  0x3b   : > { %s1578_s17 = smov [#allocation10]   ;;  %s354_s11 = sshll.u32 %s1943_s7, 4  ;;  %s355_s11 = int_to_ptr.hbm [resolvable:$true] %s354_s11 }
  0x3c   : > { %s339_s29 = sshll.u32 %s1578_s17, 4  ;;  %s1981_s9 = smov 4   ;;  %s340_s29 = int_to_ptr.vmem [resolvable:$true] %s339_s29 }
  0x3d   : > { %s1982_s27 = smov 64   ;;  %s1579_s3 = smov [#allocation11]  }
  0x3e   : > { %1215 = dma.hbm_to_vmem [thread:$0]  (!%p1689_p6), %s338_s10, 256, %s340_s29, [#allocation9], %s1982_s27, %s1982_s27, %s1981_s9  }
  0x3f   : > { %s356_s16 = sshll.u32 %s1579_s3, 4  ;;  %s387_s12 = scalar_lea.hbm %s1936_s0, %s1130_s14  ;;  %s357_s16 = int_to_ptr.vmem [resolvable:$true] %s356_s16 }
  0x40   : > { %1218 = dma.hbm_to_vmem [thread:$0]  (!%p1689_p6), %s355_s11, 256, %s357_s16, [#allocation12], %s1982_s27, %s1982_s27, %s1981_s9  }
  0x41   : > { %s389_s17 = sshll.u32 %s387_s12, 4  ;;  %s1983_s26 = sshll.u32 %s1726_s23, 3  ;;  %s390_s17 = int_to_ptr.hbm [resolvable:$true] %s389_s17 }
  0x42   : > { %s383_s30 = scalar_lea.vmem [#allocation2], %s1983_s26  ;;  %s380_s10 = scalar_lea.sflag [#allocation3], %s1726_s23 }
  0x43   : > { %s391_s1 = sshll.u32 %s383_s30, 4  ;;  %s1435_s29 = sshra.s32 %s390_s17, 4  ;;  %s392_s1 = int_to_ptr.vmem [resolvable:$true] %s391_s1  ;;  %s1436_s29 = int_to_ptr.hbm [resolvable:$true] %s1435_s29 }
  0x44   : > { %s1437_s3 = scalar_lea.hbm %s1436_s29, 8  ;;  %s1442_s19 = scalar_lea.hbm %s1936_s0, 16 }
  0x45   : > { %p1438_p1 = scmp.ne.s32.totalorder %s1436_s29, %s1437_s3  ;;  %p1443_p6 = scmp.lt.s32.totalorder %s1436_s29, %s1936_s0 }
  0x46   : > { %p1444_p11 = scmp.lt.s32.totalorder %s1442_s19, %s1437_s3 }
  0x47   : > { %p1440_p7 = pnand %p1438_p1, %p1349_p9 }
  0x48   : > { %p1445_p12 = por %p1444_p11, %p1443_p6 }
  0x49   : > { %p1441_p10 = pneg %p1440_p7 }
  0x4b   : > { %p1446_p2 = pnand %p1445_p12, %p1441_p10 }
  0x4d   : > { %1449 = shalt.err (!%p1446_p2)
}
  0x4e   : > { %1222 = dma.hbm_to_vmem [thread:$0]  (!%p1734_p8), %s390_s17, 128, %s392_s1, %s380_s10  }
  0x4f   : > { %s423_s13 = scalar_lea.hbm %s1938_s2, %s1573_s20  ;;  %s420_s26 = scalar_lea.vmem [#allocation7], %s1726_s23 }
  0x50   : > { %s425_s12 = sshll.u32 %s423_s13, 4  ;;  %s427_s30 = sshll.u32 %s420_s26, 4  ;;  %s426_s12 = int_to_ptr.hbm [resolvable:$true] %s425_s12  ;;  %s428_s30 = int_to_ptr.vmem [resolvable:$true] %s427_s30 }
  0x51   : > { %s1465_s29 = sshra.s32 %s426_s12, 4  ;;  %s1472_s1 = scalar_lea.hbm %s1938_s2, 2  ;;  %s1466_s29 = int_to_ptr.hbm [resolvable:$true] %s1465_s29 }
  0x52   : > { %s1467_s3 = scalar_lea.hbm %s1466_s29, 1  ;;  %p1473_p10 = scmp.lt.s32.totalorder %s1466_s29, %s1938_s2 }
  0x53   : > { %p1468_p4 = scmp.ne.s32.totalorder %s1466_s29, %s1467_s3  ;;  %p1474_p6 = scmp.lt.s32.totalorder %s1472_s1, %s1467_s3 }
  0x55   : > { %p1470_p1 = pnand %p1468_p4, %p1349_p9  ;;  %p1475_p11 = por %p1474_p6, %p1473_p10 }
  0x57   : > { %p1471_p7 = pneg %p1470_p1 }
  0x59   : > { %p1476_p12 = pnand %p1475_p11, %p1471_p7 }
  0x5b   : > { %1479 = shalt.err (!%p1476_p12)
}
  0x5c   : > { %1228 = dma.hbm_to_vmem [thread:$0]  (!%p1734_p8), %s426_s12, 16, %s428_s30, %s1749_s22  }
  0x5d   : > { %436 = sbr.rel (%p1680_p3) target bundleno = 1439 (0x59f), region = 64  ;;  %s1817_s23 = sand.u32 (!%p1680_p3), 1, %s1565_s18  }
  0x5e   : > { %s1820_s19 = sshll.u32 (!%p1680_p3), %s1817_s23, 3  ;;  %s439_s11 = scalar_lea.sflag (!%p1680_p3), [#allocation3], %s1817_s23 }
  0x5f   : > { %s442_s9 = scalar_lea.vmem (!%p1680_p3), [#allocation2], %s1820_s19 }
  0x62   : > { %1540 = dma.done.wait (%p1716_p13), %s439_s11, 128  }
  0x63   : > { %1542 = vsyncadd (%p1716_p13), %s439_s11, 4294967168  ;;  %s448_s25 = sand.u32 1, %s1675_s24   ;;  %s452_s15 = scalar_lea.vmem [#allocation5], %s1820_s19 }
  0x64   : > { %s449_s22 = scalar_lea.sflag [#allocation6], %s448_s25 }
  0x65   : > { %1544 = dma.done.wait (%p1716_p13), %s449_s22, 144  }
  0x66   : > { %1546 = vsyncadd (%p1716_p13), %s449_s22, 4294967152  ;;  %s461_s27 = scalar_lea.vmem [#allocation7], %s1817_s23  ;;  %p1984_p3 = scmp.eq.s32.totalorder %s1675_s24, 0 }
  0x68   : > { %1548 = dma.done.wait (%p1984_p3), [#allocation9], 512   ;;  %p1985_p8 = pmov %p1984_p3 }
  0x69   : > { %p1986_p9 = pmov %p1984_p3 }
  0x6a   : > { %1550 = vsyncadd (%p1985_p8), [#allocation9], 4294966784 }
  0x6b   : > { %1552 = dma.done.wait (%p1986_p9), [#allocation12], 256   ;;  %p1987_p2 = pmov %p1984_p3 }
  0x6c   : > { %v1184_v0 = vld [vmem:[#allocation8 + $0x8] sm:$0xff]  ;;  %v1186_v1 = vld [vmem:[#allocation10 + $0x8] sm:$0xff]  ;;  %v1183_v2 = vld [vmem:[#allocation8] sm:$0xff]  ;;  %vm551_vm0 = vcmask 261120   ;;  %vm606_vm1 = vcmask 64512   ;;  %s1580_s26 = smov 104  }
  0x6d   : > { %1554 = vsyncadd (%p1987_p2), [#allocation12], 4294967040  ;;  %v1185_v3 = vld [vmem:[#allocation10] sm:$0xff]  ;;  %v1843_v4 = vld [vmem:[%s442_s9] sm:$0xff]  ;;  %561 = vmatpush.bf16.msra.mxu0 %v1184_v0  ;;  %598 = vmatpush.bf16.msra.mxu1 %v1186_v1  ;;  %s1581_s30 = smov 112   ;;  %s1582_s29 = smov 120  }
  0x6e   : > { %v527_v5 = vld [vmem:[%s452_s15] sm:$0xff]  ;;  %v530_v6 = vpack.c.bf16 %v1843_v4, %v1843_v4  ;;  %v1290_v8 = vld [vmem:[%s1942_s6] ss:$0 sm:$0xff]  ;;  %s1583_s3 = smov 96   ;;  %s1584_s28 = smov 72   ;;  %vm889_vm2 = vcmask 130048  }
  0x6f   : > { %v568_v7 = vpack.c.bf16 %v527_v5, %v527_v5  ;;  %v1289_v9 = vld [vmem:[%s1940_s4] ss:$0 sm:$0xff]  ;;  %s1585_s14 = smov 88   ;;  %s1586_s1 = smov 80   ;;  %vm891_vm3 = vcmask 195584  }
  0x70   : > { %v1291_v22 = vld [vmem:[%s461_s27] ss:$0 sm:$0xff]  ;;  %s1587_s17 = smov 8   ;;  %s1588_s10 = smov 24  }
  0x71   : > { %562 = vmatpush.bf16.msra.mxu0 %v1183_v2  ;;  %599 = vmatpush.bf16.msra.mxu1 %v1185_v3  ;;  %s1589_s11 = smov 16   ;;  %s1180_s22 = sshll.u32 %s1675_s24, 3 }
  0x72   : > { %s1988_s21 = sld [smem:[#allocation27_spill]]  ;;  %s524_s24 = scalar_lea.vmem [#allocation13], %s1820_s19 }
  0x73   : > { %s1989_s12 = sld [smem:[#allocation29_spill]] }
  0x74   : > { %1148 = vmatmul.msk.bf16.vlgmr.msra.gmra.mxu0 %vm551_vm0, %v530_v6  ;;  %1157 = vmatmul.msk.bf16.vlgmr.msra.gmra.mxu1 %vm551_vm0, %v568_v7 }
  0x79   : > { %s1515_s19 = scalar_lea.hbm %s1989_s12, 16 }
  0xf1   : > { %v564_v10 = vpop.f32.mrf.mxu0  ;;  %v601_v11 = vpop.f32.mrf.mxu1 }
  0xf2   : > { %v1855_v12 = vadd.f32 %v1290_v8, %v601_v11  ;;  %v565_v13 = vadd.f32 %v1289_v9, %v564_v10 }
  0xf4   : > { %811 = vrot.lane.b32.xlu2 %v1855_v12, %s1580_s26  ;;  %744 = vrot.lane.b32.xlu1 %v1855_v12, %s1581_s30 }
  0xf5   : > { %677 = vrot.lane.b32.xlu0 %v1855_v12, %s1582_s29  ;;  %1158 = vmatpush.xpose.msk.msra.mxu2 %vm606_vm1, %v1855_v12 }
  0xf8   : > { %1159 = vmatmul.msk.f32.vlgmr.msra.gmra.mxu2 %vm606_vm1, %v565_v13 }
  0xf9   : > { %v566_v14 = vpop.f32.mrf.mxu0  ;;  %v603_v15 = vpop.f32.mrf.mxu1 }
  0xfc   : > { %809 = vrot.lane.b32.xlu2 %v565_v13, %s1580_s26  ;;  %742 = vrot.lane.b32.xlu1 %v565_v13, %s1581_s30  ;;  %s980_s26 = scalar_lea.hbm %s1989_s12, %s1180_s22 }
  0xfd   : > { %675 = vrot.lane.b32.xlu0 %v565_v13, %s1582_s29 }
 0x14e   : > { %v812_v16 = vpop.permute.xlu2 %811 }
 0x14f   : > { %1167 = vmatpush.xpose.msk.msrb.mxu0 %vm606_vm1, %v812_v16  ;;  %v1188_v16 = vld [vmem:[#allocation11 + $0x8] sm:$0xff] }
 0x156   : > { %v810_v17 = vpop.permute.xlu2 %809 }
 0x157   : > { %1168 = vmatmul.msk.f32.vlgmr.msrb.gmra.mxu0 %vm606_vm1, %v810_v17  ;;  %v1187_v17 = vld [vmem:[#allocation11] sm:$0xff] }
 0x166   : > { %v745_v18 = vpop.permute.xlu1 %744 }
 0x167   : > { %v678_v19 = vpop.permute.xlu0 %677 }
 0x168   : > { %1161 = vmatpush.xpose.msk.msra.mxu3 %vm606_vm1, %v678_v19 }
 0x16c   : > { %1164 = vmatpush.xpose.msk.msrb.mxu3 %vm606_vm1, %v745_v18 }
 0x16e   : > { %v743_v21 = vpop.permute.xlu1 %742 }
 0x16f   : > { %v676_v20 = vpop.permute.xlu0 %675 }
 0x170   : > { %1162 = vmatmul.msk.f32.vlgmr.msra.gmra.mxu3 %vm606_vm1, %v676_v20 }
 0x171   : > { %923 = vmatpush.bf16.msra.mxu3 %v1188_v16 }
 0x175   : > { %924 = vmatpush.bf16.msra.mxu3 %v1187_v17 }
 0x178   : > { %1165 = vmatmul.msk.f32.vlgmr.msrb.gmra.mxu3 %vm606_vm1, %v743_v21 }
 0x17b   : > { %v630_v23 = vpop.f32.mrf.mxu2 }
 0x17c   : > { %v633_v24 = vmul.f32 0.35355338, %v630_v23 }
 0x17e   : > { %v637_v25 = vadd.f32 %v1291_v22, %v633_v24 }
 0x180   : > { %v638_v26 = vsel %vm606_vm1, %v637_v25, -inf }
 0x181   : > { %639 = vmax.xlane.f32.xlu0 %v638_v26 }
 0x1d4   : > { %v834_v36 = vpop.f32.mrf.mxu0 }
 0x1d5   : > { %v837_v39 = vmul.f32 0.35355338, %v834_v36 }
 0x1d7   : > { %v838_v42 = vadd.f32 %v1291_v22, %v837_v39 }
 0x1d9   : > { %v839_v43 = vsel %vm606_vm1, %v838_v42, -inf }
 0x1f3   : > { %v700_v27 = vpop.f32.mrf.mxu3 }
 0x1f4   : > { %v703_v28 = vmul.f32 0.35355338, %v700_v27  ;;  %v640_v29 = vpop.xlane.xlu0 %639 }
 0x1f5   : > { %v641_v30 = vsub.f32 %v637_v25, %v640_v29  ;;  %v1292_v25 = vld [vmem:[%s1944_s8] ss:$0 sm:$0xff] }
 0x1f6   : > { %v704_v31 = vadd.f32 %v1291_v22, %v703_v28 }
 0x1f7   : > { %v642_v32 = vmul.f32 1.442695, %v641_v30 }
 0x1f8   : > { %v705_v33 = vsel %vm606_vm1, %v704_v31, -inf }
 0x1f9   : > { %1295 = vpow2.f32 %v642_v32  ;;  %706 = vmax.xlane.f32.xlu1 %v705_v33 }
 0x1fb   : > { %v767_v34 = vpop.f32.mrf.mxu3 }
 0x1fc   : > { %v770_v35 = vmul.f32 0.35355338, %v767_v34 }
 0x1fe   : > { %v771_v37 = vadd.f32 %v1291_v22, %v770_v35 }
 0x1ff   : > { %v1296_v38 = vpop.eup %1295 }
 0x200   : > { %v772_v40 = vsel %vm606_vm1, %v771_v37, -inf  ;;  %v644_v41 = vsel %vm606_vm1, %v1296_v38, 0.0 }
 0x201   : > { %773 = vmax.xlane.f32.xlu2 %v772_v40  ;;  %645 = vadd.xlane.f32.xlu0 %v644_v41 }
 0x209   : > { %840 = vmax.xlane.f32.xlu2 %v839_v43 }
 0x221   : > { %649 = vrot.lane.b32.xlu2 %v1855_v12, %s1583_s3 }
 0x229   : > { %850 = vrot.lane.b32.xlu2 %v1855_v12, %s1584_s28  ;;  %s1991_s28 = sld [smem:[#allocation28_spill]] }
 0x26c   : > { %v707_v44 = vpop.xlane.xlu1 %706 }
 0x26d   : > { %v708_v45 = vsub.f32 %v704_v31, %v707_v44  ;;  %v1590_v31 = vmov 32.0  }
 0x26f   : > { %v709_v46 = vmul.f32 1.442695, %v708_v45 }
 0x271   : > { %1297 = vpow2.f32 %v709_v46 }
 0x274   : > { %v774_v47 = vpop.xlane.xlu2 %773  ;;  %v646_v49 = vpop.xlane.xlu0 %645 }
 0x275   : > { %1299 = vrcp.f32 %v646_v49  ;;  %v775_v53 = vsub.f32 %v771_v37, %v774_v47 }
 0x277   : > { %v1298_v48 = vpop.eup %1297  ;;  %v776_v56 = vmul.f32 1.442695, %v775_v53 }
 0x278   : > { %v711_v50 = vsel %vm606_vm1, %v1298_v48, 0.0 }
 0x279   : > { %712 = vadd.xlane.f32.xlu1 %v711_v50 }
 0x27b   : > { %v1300_v55 = vpop.eup %1299 }
 0x27c   : > { %v841_v51 = vpop.xlane.xlu2 %840  ;;  %v648_v58 = vmul.f32 %v1300_v55, %v1296_v38 }
 0x27d   : > { %v842_v52 = vsub.f32 %v838_v42, %v841_v51  ;;  %v1293_v51 = vld [vmem:[%s1988_s21] ss:$0 sm:$0xff] }
 0x27f   : > { %v843_v54 = vmul.f32 1.442695, %v842_v52 }
 0x281   : > { %1301 = vpow2.f32 %v843_v54  ;;  %v1294_v54 = vld [vmem:[%s1991_s28] ss:$0 sm:$0xff] }
 0x282   : > { %1303 = vpow2.f32 %v776_v56 }
 0x284   : > { %v650_v57 = vpop.permute.xlu2 %649 }
 0x285   : > { %670 = vmatpush.msrb.mxu2 %v650_v57 }
 0x286   : > { %1160 = vmatmul.msk.f32.vlgmr.msrb.gmra.mxu2 %vm606_vm1, %v648_v58 }
 0x287   : > { %v1302_v59 = vpop.eup %1301 }
 0x288   : > { %v845_v60 = vsel %vm606_vm1, %v1302_v59, 0.0  ;;  %v1304_v62 = vpop.eup %1303 }
 0x289   : > { %846 = vadd.xlane.f32.xlu0 %v845_v60  ;;  %v778_v63 = vsel %vm606_vm1, %v1304_v62, 0.0 }
 0x28c   : > { %v851_v61 = vpop.permute.xlu2 %850 }
 0x28d   : > { %871 = vmatpush.msrb.mxu1 %v851_v61 }
 0x291   : > { %779 = vadd.xlane.f32.xlu0 %v778_v63 }
 0x292   : > { %716 = vrot.lane.b32.xlu1 %v1855_v12, %s1585_s14  ;;  %s982_s14 = sshll.u32 %s524_s24, 4  ;;  %s983_s14 = int_to_ptr.vmem [resolvable:$true] %s982_s14 }
 0x2a5   : > { %783 = vrot.lane.b32.xlu0 %v1855_v12, %s1586_s1  ;;  %s984_s1 = sshll.u32 %s980_s26, 4  ;;  %s985_s1 = int_to_ptr.hbm [resolvable:$true] %s984_s1 }
 0x2ec   : > { %v713_v0 = vpop.xlane.xlu1 %712 }
 0x2ed   : > { %1305 = vrcp.f32 %v713_v0 }
 0x2f3   : > { %v1306_v2 = vpop.eup %1305 }
 0x2f4   : > { %v715_v5 = vmul.f32 %v1306_v2, %v1298_v48 }
 0x2fc   : > { %v847_v1 = vpop.xlane.xlu0 %846 }
 0x2fd   : > { %1307 = vrcp.f32 %v847_v1 }
 0x303   : > { %v1308_v3 = vpop.eup %1307 }
 0x304   : > { %v717_v6 = vpop.permute.xlu1 %716  ;;  %v849_v7 = vmul.f32 %v1308_v3, %v1302_v59  ;;  %v780_v8 = vpop.xlane.xlu0 %779 }
 0x305   : > { %737 = vmatpush.msra.mxu2 %v717_v6  ;;  %1309 = vrcp.f32 %v780_v8 }
 0x306   : > { %1163 = vmatmul.msk.f32.vlgmr.msra.gmra.mxu2 %vm606_vm1, %v715_v5  ;;  %1169 = vmatmul.msk.f32.vlgmr.msrb.gmra.mxu1 %vm606_vm1, %v849_v7  ;;  %1311 = vrcp.f32 %v1590_v31 }
 0x309   : > { %v672_v12 = vpop.f32.mrf.mxu2 }
 0x30b   : > { %v1310_v9 = vpop.eup %1309 }
 0x30c   : > { %v782_v10 = vmul.f32 %v1310_v9, %v1304_v62  ;;  %v1312_v32 = vpop.eup %1311 }
 0x30d   : > { %v935_v33 = vmul.f32 32.0, %v1312_v32  ;;  %vm939_vm4 = vweird.f32 %v1312_v32 }
 0x30f   : > { %v936_v34 = vsub.f32 1.0, %v935_v33 }
 0x311   : > { %v937_v35 = vmul.f32 %v1312_v32, %v936_v34 }
 0x313   : > { %v938_v36 = vadd.f32 %v1312_v32, %v937_v35 }
 0x315   : > { %v940_v37 = vsel %vm939_vm4, %v1312_v32, %v938_v36 }
 0x317   : > { %v784_v11 = vpop.permute.xlu0 %783 }
 0x318   : > { %804 = vmatpush.msrb.mxu2 %v784_v11 }
 0x319   : > { %1166 = vmatmul.msk.f32.vlgmr.msrb.gmra.mxu2 %vm606_vm1, %v782_v10 }
 0x383   : > { %v873_v14 = vpop.f32.mrf.mxu1 }
 0x389   : > { %v739_v13 = vpop.f32.mrf.mxu2 }
 0x38a   : > { %877 = vrot.lane.b32.xlu1 %v739_v13, %s1587_s17  ;;  %s970_s17 = scalar_lea.sflag [#allocation4], %s1817_s23 }
 0x392   : > { %885 = vrot.lane.b32.xlu1 %v873_v14, %s1588_s10  ;;  %s1509_s10 = sshra.s32 %s985_s1, 4  ;;  %s1510_s10 = int_to_ptr.hbm [resolvable:$true] %s1509_s10 }
 0x393   : > { %p1516_p7 = scmp.lt.s32.totalorder %s1510_s10, %s1989_s12 }
 0x39c   : > { %v806_v15 = vpop.f32.mrf.mxu2 }
 0x39d   : > { %881 = vrot.lane.b32.xlu2 %v806_v15, %s1589_s11  ;;  %s1511_s11 = scalar_lea.hbm %s1510_s10, 8 }
 0x39e   : > { %p1512_p13 = scmp.ne.s32.totalorder %s1510_s10, %s1511_s11  ;;  %p1517_p10 = scmp.lt.s32.totalorder %s1515_s19, %s1511_s11 }
 0x3a0   : > { %p1513_p4 = pnand %p1512_p13, %p1720_p0  ;;  %p1518_p6 = por %p1517_p10, %p1516_p7 }
 0x3a2   : > { %p1514_p1 = pneg %p1513_p4 }
 0x3a4   : > { %p1519_p11 = pnand %p1518_p6, %p1514_p1 }
 0x3f7   : > { %v882_v20 = vpop.permute.xlu2 %881 }
 0x3fc   : > { %v878_v18 = vpop.permute.xlu1 %877 }
 0x3fd   : > { %v888_v19 = vsel %vm606_vm1, %v672_v12, %v878_v18 }
 0x3fe   : > { %v890_v22 = vsel %vm889_vm2, %v888_v19, %v882_v20 }
 0x404   : > { %v886_v21 = vpop.permute.xlu1 %885 }
 0x405   : > { %v892_v23 = vsel %vm891_vm3, %v890_v22, %v886_v21 }
 0x406   : > { %v893_v24 = vpack.c.bf16 %v892_v23, %v892_v23 }
 0x408   : > { %1178 = vmatmul.msk.bf16.vlgmr.msra.gmra.mxu3 %vm551_vm0, %v893_v24 }
 0x48b   : > { %v926_v26 = vpop.f32.mrf.mxu3 }
 0x48c   : > { %v927_v27 = vadd.f32 %v1292_v25, %v926_v26 }
 0x48e   : > { %v930_v28 = vadd.f32 %v927_v27, %v1843_v4 }
 0x490   : > { %v931_v29 = vsel %vm551_vm0, %v930_v28, 0.0 }
 0x491   : > { %932 = vadd.xlane.f32.xlu0 %v931_v29 }
 0x493   : > { %v928_v30 = vpop.f32.mrf.mxu3 }
 0x504   : > { %v933_v38 = vpop.xlane.xlu0 %932 }
 0x505   : > { %v941_v39 = vmul.f32 %v940_v37, %v933_v38 }
 0x507   : > { %v942_v40 = vsub.f32 %v930_v28, %v941_v39 }
 0x509   : > { %v943_v41 = vmul.f32 %v942_v40, %v942_v40 }
 0x50b   : > { %v944_v4 = vsel %vm551_vm0, %v943_v41, 0.0 }
 0x50c   : > { %945 = vadd.xlane.f32.xlu2 %v944_v4 }
 0x57f   : > { %v946_v42 = vpop.xlane.xlu2 %945 }
 0x580   : > { %v947_v43 = vmul.f32 %v946_v42, %v940_v37 }
 0x582   : > { %v948_v44 = vadd.f32 1e-05, %v947_v43 }
 0x584   : > { %1313 = vrsqrt.f32 %v948_v44  ;;  %vm955_vm6 = vweird.f32 %v948_v44 }
 0x58a   : > { %v1314_v45 = vpop.eup %1313 }
 0x58b   : > { %v950_v46 = vmul.f32 %v1314_v45, %v948_v44  ;;  %vm956_vm5 = vweird.f32 %v1314_v45 }
 0x58c   : > { %vm957_vm7 = vmor %vm955_vm6, %vm956_vm5 }
 0x58d   : > { %v951_v47 = vmul.f32 %v1314_v45, %v950_v46 }
 0x58f   : > { %v952_v48 = vmul.f32 0.5, %v951_v47 }
 0x591   : > { %v953_v49 = vsub.f32 1.5, %v952_v48 }
 0x593   : > { %v954_v50 = vmul.f32 %v1314_v45, %v953_v49 }
 0x595   : > { %v958_v52 = vsel %vm957_vm7, %v1314_v45, %v954_v50 }
 0x596   : > { %v959_v53 = vmul.f32 %v958_v52, %v942_v40 }
 0x598   : > { %v963_v55 = vmul.f32 %v1293_v51, %v959_v53 }
 0x59a   : > { %v967_v56 = vadd.f32 %v1294_v54, %v963_v55 }
 0x59c   : > { %968 = vst.msk [vmem:[%s524_s24] sm:$0xff] %vm551_vm0, %v967_v56 }
 0x59d   : > { %1522 = shalt.err (!%p1519_p11)
}
 0x59e   : > { %1207 = dma.vmem_to_hbm [thread:$0]  (%p1720_p0), %s983_s14, 128, %s985_s1, %s970_s17  }
 0x59f PF: > { %s1992_s23 = sld [smem:[#allocation19_spill]]  ;;  %p1994_p12 = scmp.ge.s32.totalorder %s1573_s20, 2 }
 0x5a1   : > { %p1230_p3 = pnand %p1994_p12, %p1728_p5 }
 0x5a3   : > { %p1231_p8 = pneg %p1230_p3 }
 0x5a5   : > { %s996_s21 = sand.u32 1, %s1992_s23  }
 0x5a6   : > { %s997_s16 = scalar_lea.sflag [#allocation4], %s996_s21 }
 0x5a7   : > { %1556 = dma.done.wait (%p1231_p8), %s997_s16, 128  }
 0x5a8   : > { %1558 = vsyncadd (%p1231_p8), %s997_s16, 4294967168  ;;  %s1995_s20 = sld [smem:[#allocation21_spill]]  ;;  %s1998_s17 = smov %s1565_s18 }
 0x5a9   : > { %s1996_s13 = sld [smem:[#allocation20_spill]] }
 0x5aa   : > { %s1997_s19 = sld [smem:[#allocation22_spill]] }
 0x5ae   : > { %p29_p9 = scmp.ge.s32.totalorder %s1995_s20, 4  }
 0x5af   : > { %s1999_s18 = smov %s1996_s13 }
 0x5b0   :  { %31 = sbr.rel (!%p29_p9) target bundleno = 15 (0xf), region = 145 }
 0x5b5   :  { %1003 = vsyncpa [#allocation3], 1 }
 0x5b6   :  { %1005 = vsyncpa [#allocation3 + $0x1], 1 }
 0x5b7   :  { %1006 = vsyncpa [#allocation6], 1 }
 0x5b8   :  { %1008 = vsyncpa [#allocation6 + $0x1], 1 }
 0x5b9   :  { %1009 = vsyncpa [#allocation9], 1 }
 0x5ba   :  { %1010 = vsyncpa [#allocation12], 1 }
 0x5bb   :  { %1011 = vsyncpa [#allocation4], 1 }
 0x5bc   :  { %1013 = vsyncpa [#allocation4 + $0x1], 1 }

</bundles_post_ra>
